<compile_context>
chip_gen: v7x
topology: tpu7x:2x2x1
jax: 0.10.0
libtpu: 0.0.40
codegen_flags: <defaults>
</compile_context>

<pallas_src>
import functools

import jax
import jax.numpy as jnp
from jax.experimental import pallas as pl
from jax.experimental.pallas import tpu as pltpu


def _round_up(x, m):
    return (x + m - 1) // m * m


def _padded_bytes(shape, itemsize):
    """VMEM footprint of an array, padding the last two dims to (8, 128) tiles."""
    lead = 1
    for d in shape[:-2]:
        lead *= d
    return lead * _round_up(shape[-2], 8) * _round_up(shape[-1], 128) * itemsize


def _pick_row_pack(h, w):
    """Rows packed per lane-group: best lane density with bounded band-matrix size."""
    if w >= 128:
        return 1

    def density(rh):
        rw = rh * w
        return rw / (128.0 * ((rw + 127) // 128))

    best = 1
    for rh in range(2, h + 1):
        if h % rh:
            continue
        rw = rh * w
        ndg = 2 * ((rh + 2) // rh) + 1
        if 2 * ndg * rw * rw * 4 > (4 << 20):      # keep band matrices under ~4 MiB
            continue
        if density(rh) > density(best) + 1e-9:
            best = rh
    return best


def _pick_c_tile(c, plane_bytes, budget=2 << 20):
    """Largest divisor of C whose (c_tile, Hg, RH*W) block stays under `budget`."""
    if c * plane_bytes <= budget:
        return c
    best = 1
    for t in range(1, c):
        if c % t == 0 and t * plane_bytes <= budget:
            best = t
    return best


def _spatial_attention_kernel(x_ref, band_ref, b_ref, o_ref, stat_ref, pad_ref,
                              *, total_c):
    # x_ref   : (1, c_tile, Hg, RW)  channel tile of x, native dtype, lane-dense
    # band_ref: (2, ndg, RW, RW)     band matrices (whole array resident in VMEM)
    # b_ref   : (1,) SMEM            conv bias
    # o_ref   : (1, Hg, RW)          sigmoid attention map (packed-row layout)
    # stat_ref: (2, Hg, RW) VMEM     running [channel-sum, channel-max] in f32
    # pad_ref : (2, Hg+2*gpad, RW)   row-group zero-padded stats for the conv
    ci = pl.program_id(1)
    last_ci = pl.num_programs(1) - 1
    hg, rw = stat_ref.shape[1], stat_ref.shape[2]
    ndg = band_ref.shape[1]
    gpad = (pad_ref.shape[1] - hg) // 2

    # Channel reduction over the leading (non-lane) dim -> pure VPU work, f32 accum.
    x = x_ref[0].astype(jnp.float32)               # (c_tile, Hg, RW)
    part_sum = jnp.sum(x, axis=0)                  # (Hg, RW)
    part_max = jnp.max(x, axis=0)

    @pl.when(ci == 0)
    def _init():
        stat_ref[0] = part_sum
        stat_ref[1] = part_max
        # Zero only the halo row-groups; the interior is overwritten every epilogue.
        zero_halo = jnp.zeros((gpad, rw), jnp.float32)
        pad_ref[0, :gpad, :] = zero_halo
        pad_ref[1, :gpad, :] = zero_halo
        pad_ref[0, gpad + hg:, :] = zero_halo
        pad_ref[1, gpad + hg:, :] = zero_halo

    @pl.when(ci > 0)
    def _accumulate():
        stat_ref[0] = stat_ref[0] + part_sum
        stat_ref[1] = jnp.maximum(stat_ref[1], part_max)

    @pl.when(ci == last_ci)
    def _conv_epilogue():
        pad_ref[0, gpad:gpad + hg, :] = stat_ref[0] * (1.0 / total_c)   # channel mean
        pad_ref[1, gpad:gpad + hg, :] = stat_ref[1]                     # channel max
        acc = jnp.full((hg, rw), b_ref[0], jnp.float32)
        mm_dtype = band_ref.dtype
        for c in range(2):                          # avg / max stat channel
            for d in range(ndg):                    # row-group shifts of the kh taps
                acc = acc + jnp.dot(pad_ref[c, d:d + hg, :].astype(mm_dtype),
                                    band_ref[c, d],
                                    preferred_element_type=jnp.float32)
        o_ref[0] = jax.nn.sigmoid(acc)


def spatial_attention_forward(x_nchw, weight, bias, *, c_tile=None,
                              matmul_dtype=jnp.float32):
    """CBAM spatial attention forward.

    x_nchw: (N, C, H, W), any float dtype (streamed in its native dtype).
    weight: (1, 2, 7, 7) PyTorch OIHW Conv2d weight;  bias: (1,).
    Returns the (N, 1, H, W) sigmoid attention map in f32.
    On v5e pass matmul_dtype=jnp.bfloat16 (accumulation stays f32).
    """
    n, c_total, h, w = x_nchw.shape
    assert weight.shape == (1, 2, 7, 7) and bias.shape == (1,)

    rh = _pick_row_pack(h, w)                 # image rows packed per lane-group
    hg, rw = h // rh, rh * w
    dg_max = (rh + 2) // rh                   # row-group reach of the +/-3 kh taps
    ndg = 2 * dg_max + 1

    # Free (contiguous) reshape: pack rh image rows onto the lane axis.
    x = x_nchw.reshape(n, c_total, hg, rw)

    # Band matrices fold the kh taps (within / across packed row-groups), the kw taps
    # and the implicit spatial zero padding into dense (rw, rw) matmul operands:
    #   band[c, dg, ri*W+wi, ro*W+wo] = wgt[c, dg*rh + ri - ro + 3, wi - wo + 3]
    # (zero where the tap indices fall outside the 7x7 kernel).
    wgt = weight.astype(jnp.float32)[0]                            # (2, 7, 7)
    dg = jnp.arange(-dg_max, dg_max + 1)
    r_i = jnp.arange(rh)[None, :, None, None, None]
    w_i = jnp.arange(w)[None, None, :, None, None]
    r_o = jnp.arange(rh)[None, None, None, :, None]
    w_o = jnp.arange(w)[None, None, None, None, :]
    kh = dg[:, None, None, None, None] * rh + r_i - r_o + 3        # (ndg,rh,1,rh,1)
    kw = w_i - w_o + 3                                             # (1,1,w,1,w)
    valid = (kh >= 0) & (kh < 7) & (kw >= 0) & (kw < 7)
    band = jnp.where(valid[None], wgt[:, jnp.clip(kh, 0, 6), jnp.clip(kw, 0, 6)], 0.0)
    band = band.reshape(2, ndg, rw, rw).astype(matmul_dtype)

    # Channel tile: bound the per-step x block (and VMEM) regardless of C.
    x_item = x.dtype.itemsize
    if c_tile is None:
        c_tile = _pick_c_tile(c_total, _padded_bytes((hg, rw), x_item))
    assert c_total % c_tile == 0, (c_total, c_tile)
    grid = (n, c_total // c_tile)

    # Explicit VMEM accounting (double-buffered x/out blocks, single-buffered band).
    est = (2 * _padded_bytes((1, c_tile, hg, rw), x_item)                         # x
           + _padded_bytes((2, ndg, rw, rw), jnp.dtype(matmul_dtype).itemsize)    # band
           + 2 * _padded_bytes((1, hg, rw), 4)                                    # out
           + _padded_bytes((2, hg, rw), 4)                                        # stats
           + _padded_bytes((2, hg + 2 * dg_max, rw), 4))                          # pad
    vmem_limit = max(32 << 20, min(int(1.5 * est) + (2 << 20), 96 << 20))

    out_packed = pl.pallas_call(
        functools.partial(_spatial_attention_kernel, total_c=c_total),
        out_shape=jax.ShapeDtypeStruct((n, hg, rw), jnp.float32),
        grid=grid,
        in_specs=[
            pl.BlockSpec((1, c_tile, hg, rw), lambda ni, ci: (ni, ci, 0, 0)),
            # Grid-constant operand -> whole-array, single VMEM copy (no double buffer).
            pl.BlockSpec(memory_space=pltpu.MemorySpace.VMEM),
            pl.BlockSpec(memory_space=pltpu.MemorySpace.SMEM),
        ],
        out_specs=pl.BlockSpec((1, hg, rw), lambda ni, ci: (ni, 0, 0)),
        scratch_shapes=[
            pltpu.VMEM((2, hg, rw), jnp.float32),                 # running sum / max
            pltpu.VMEM((2, hg + 2 * dg_max, rw), jnp.float32),    # zero-padded stats
        ],
        compiler_params=pltpu.CompilerParams(
            dimension_semantics=("parallel", "arbitrary"),
            vmem_limit_bytes=vmem_limit),
    )(x, band, bias.astype(jnp.float32))

    return out_packed.reshape(n, 1, h, w)


def _reference(x, weight, bias):
    """Pure-JAX reference matching the PyTorch module (eval semantics)."""
    avg = jnp.mean(x, axis=1, keepdims=True)
    mx = jnp.max(x, axis=1, keepdims=True)
    s = jnp.concatenate([avg, mx], axis=1)                 # (N, 2, H, W)
    conv = jax.lax.conv_general_dilated(
        s, weight.astype(jnp.float32), window_strides=(1, 1),
        padding=((3, 3), (3, 3)),
        dimension_numbers=("NCHW", "OIHW", "NCHW"))
    return jax.nn.sigmoid(conv + bias.reshape(1, 1, 1, 1))


if __name__ == "__main__":
    key = jax.random.PRNGKey(0)
    kx, kw_key, kb, kx2 = jax.random.split(key, 4)

    weight = jax.random.normal(kw_key, (1, 2, 7, 7), jnp.float32) * 0.1   # Conv2d(2,1,7)
    bias = jax.random.normal(kb, (1,), jnp.float32) * 0.1

    # Test 1: f32 input, channels fit in a single reduction step.
    N, C, H, W = 2, 4, 16, 16
    x = jax.random.normal(kx, (N, C, H, W), jnp.float32)
    out = jax.block_until_ready(spatial_attention_forward(x, weight, bias))
    assert out.shape == (N, 1, H, W), out.shape
    ref = jax.block_until_ready(_reference(x, weight, bias))
    err = float(jnp.max(jnp.abs(out - ref)))
    assert jnp.allclose(out, ref, atol=1e-3, rtol=1e-3), err

    # Test 2: bf16 input streamed in native dtype, multi-step channel reduction.
    C2 = 32
    x2 = jax.random.normal(kx2, (N, C2, H, W), jnp.float32).astype(jnp.bfloat16)
    out2 = jax.block_until_ready(spatial_attention_forward(x2, weight, bias, c_tile=8))
    assert out2.shape == (N, 1, H, W), out2.shape
    ref2 = jax.block_until_ready(_reference(x2.astype(jnp.float32), weight, bias))
    err2 = float(jnp.max(jnp.abs(out2 - ref2)))
    assert jnp.allclose(out2, ref2, atol=1e-3, rtol=1e-3), err2

    print("KERNEL_OK")
</pallas_src>

<mosaic_0001>
module attributes {stable_mosaic.version = 11 : i64} {
  func.func @_spatial_attention_kernel(%arg0: i32, %arg1: i32, %arg2: memref<1x4x2x128xf32, #tpu.memory_space<vmem>>, %arg3: memref<2x3x128x128xf32, #tpu.memory_space<vmem>>, %arg4: memref<1xf32, #tpu.memory_space<smem>>, %arg5: memref<1x2x128xf32, #tpu.memory_space<vmem>>, %arg6: memref<2x2x128xf32, #tpu.memory_space<vmem>>, %arg7: memref<2x4x128xf32, #tpu.memory_space<vmem>>) attributes {dimension_semantics = [#tpu.dimension_semantics<parallel>, #tpu.dimension_semantics<arbitrary>], iteration_bounds = array<i64: 2, 1>, scalar_prefetch = 0 : i64, scratch_operands = 2 : i64, tpu.core_type = #tpu.core_type<tc>, window_params = [{transform_indices = @transform_0, window_bounds = array<i64: 1, 4, 2, 128>}, {pipeline_mode = #tpu.pipeline_mode<synchronous>, transform_indices = @transform_1, window_bounds = array<i64: 2, 3, 128, 128>}, {transform_indices = @transform_2, window_bounds = array<i64: 1>}, {transform_indices = @transform_3, window_bounds = array<i64: 1, 2, 128>}]} {
    %c0 = arith.constant 0 : index
    %c0_0 = arith.constant 0 : index
    %c0_1 = arith.constant 0 : index
    %c0_2 = arith.constant 0 : index
    %0 = vector.load %arg2[%c0, %c0_0, %c0_1, %c0_2] : memref<1x4x2x128xf32, #tpu.memory_space<vmem>>, vector<1x4x2x128xf32>
    %1 = vector.shape_cast %0 : vector<1x4x2x128xf32> to vector<4x2x128xf32>
    %cst = arith.constant dense<0.000000e+00> : vector<2x128xf32>
    %2 = vector.multi_reduction <add>, %1, %cst [0] : vector<4x2x128xf32> to vector<2x128xf32>
    %cst_3 = arith.constant dense<0xFF800000> : vector<2x128xf32>
    %3 = vector.multi_reduction <maximumf>, %1, %cst_3 [0] : vector<4x2x128xf32> to vector<2x128xf32>
    %c0_i32 = arith.constant 0 : i32
    %4 = arith.cmpi eq, %arg1, %c0_i32 : i32
    %5 = arith.extui %4 : i1 to i32
    %c0_i32_4 = arith.constant 0 : i32
    %6 = arith.cmpi ne, %5, %c0_i32_4 : i32
    scf.if %6 {
      %c0_9 = arith.constant 0 : index
      %c0_10 = arith.constant 0 : index
      %c0_11 = arith.constant 0 : index
      %13 = vector.load %arg6[%c0_9, %c0_10, %c0_11] : memref<2x2x128xf32, #tpu.memory_space<vmem>>, vector<1x2x128xf32>
      %14 = vector.shape_cast %13 : vector<1x2x128xf32> to vector<2x128xf32>
      %15 = vector.shape_cast %2 : vector<2x128xf32> to vector<1x2x128xf32>
      tpu.vector_store %arg6[%c0_9, %c0_10, %c0_11], %15 {strides = array<i32>} : memref<2x2x128xf32, #tpu.memory_space<vmem>>, vector<1x2x128xf32>,
      %c1 = arith.constant 1 : index
      %c0_12 = arith.constant 0 : index
      %c0_13 = arith.constant 0 : index
      %16 = vector.load %arg6[%c1, %c0_12, %c0_13] : memref<2x2x128xf32, #tpu.memory_space<vmem>>, vector<1x2x128xf32>
      %17 = vector.shape_cast %16 : vector<1x2x128xf32> to vector<2x128xf32>
      %18 = vector.shape_cast %3 : vector<2x128xf32> to vector<1x2x128xf32>
      tpu.vector_store %arg6[%c1, %c0_12, %c0_13], %18 {strides = array<i32>} : memref<2x2x128xf32, #tpu.memory_space<vmem>>, vector<1x2x128xf32>,
      %cst_14 = arith.constant 0.000000e+00 : f32
      %19 = vector.broadcast %cst_14 : f32 to vector<1x128xf32>
      %c0_15 = arith.constant 0 : index
      %c0_16 = arith.constant 0 : index
      %c0_17 = arith.constant 0 : index
      %20 = vector.load %arg7[%c0_15, %c0_16, %c0_17] : memref<2x4x128xf32, #tpu.memory_space<vmem>>, vector<1x1x128xf32>
      %21 = vector.shape_cast %20 : vector<1x1x128xf32> to vector<1x128xf32>
      %22 = vector.shape_cast %19 : vector<1x128xf32> to vector<1x1x128xf32>
      tpu.vector_store %arg7[%c0_15, %c0_16, %c0_17], %22 {strides = array<i32>} : memref<2x4x128xf32, #tpu.memory_space<vmem>>, vector<1x1x128xf32>,
      %c1_18 = arith.constant 1 : index
      %c0_19 = arith.constant 0 : index
      %c0_20 = arith.constant 0 : index
      %23 = vector.load %arg7[%c1_18, %c0_19, %c0_20] : memref<2x4x128xf32, #tpu.memory_space<vmem>>, vector<1x1x128xf32>
      %24 = vector.shape_cast %23 : vector<1x1x128xf32> to vector<1x128xf32>
      %25 = vector.shape_cast %19 : vector<1x128xf32> to vector<1x1x128xf32>
      tpu.vector_store %arg7[%c1_18, %c0_19, %c0_20], %25 {strides = array<i32>} : memref<2x4x128xf32, #tpu.memory_space<vmem>>, vector<1x1x128xf32>,
      %c0_21 = arith.constant 0 : index
      %c3 = arith.constant 3 : index
      %c0_22 = arith.constant 0 : index
      %26 = vector.load %arg7[%c0_21, %c3, %c0_22] : memref<2x4x128xf32, #tpu.memory_space<vmem>>, vector<1x1x128xf32>
      %27 = vector.shape_cast %26 : vector<1x1x128xf32> to vector<1x128xf32>
      %28 = vector.shape_cast %19 : vector<1x128xf32> to vector<1x1x128xf32>
      tpu.vector_store %arg7[%c0_21, %c3, %c0_22], %28 {strides = array<i32>} : memref<2x4x128xf32, #tpu.memory_space<vmem>>, vector<1x1x128xf32>,
      %c1_23 = arith.constant 1 : index
      %c3_24 = arith.constant 3 : index
      %c0_25 = arith.constant 0 : index
      %29 = vector.load %arg7[%c1_23, %c3_24, %c0_25] : memref<2x4x128xf32, #tpu.memory_space<vmem>>, vector<1x1x128xf32>
      %30 = vector.shape_cast %29 : vector<1x1x128xf32> to vector<1x128xf32>
      %31 = vector.shape_cast %19 : vector<1x128xf32> to vector<1x1x128xf32>
      tpu.vector_store %arg7[%c1_23, %c3_24, %c0_25], %31 {strides = array<i32>} : memref<2x4x128xf32, #tpu.memory_space<vmem>>, vector<1x1x128xf32>,
    } else {
    }
    %c0_i32_5 = arith.constant 0 : i32
    %7 = arith.cmpi sgt, %arg1, %c0_i32_5 : i32
    %8 = arith.extui %7 : i1 to i32
    %c0_i32_6 = arith.constant 0 : i32
    %9 = arith.cmpi ne, %8, %c0_i32_6 : i32
    scf.if %9 {
      %c0_9 = arith.constant 0 : index
      %c0_10 = arith.constant 0 : index
      %c0_11 = arith.constant 0 : index
      %13 = vector.load %arg6[%c0_9, %c0_10, %c0_11] : memref<2x2x128xf32, #tpu.memory_space<vmem>>, vector<1x2x128xf32>
      %14 = vector.shape_cast %13 : vector<1x2x128xf32> to vector<2x128xf32>
      %15 = arith.addf %14, %2 : vector<2x128xf32>
      %c0_12 = arith.constant 0 : index
      %c0_13 = arith.constant 0 : index
      %c0_14 = arith.constant 0 : index
      %16 = vector.load %arg6[%c0_12, %c0_13, %c0_14] : memref<2x2x128xf32, #tpu.memory_space<vmem>>, vector<1x2x128xf32>
      %17 = vector.shape_cast %16 : vector<1x2x128xf32> to vector<2x128xf32>
      %18 = vector.shape_cast %15 : vector<2x128xf32> to vector<1x2x128xf32>
      tpu.vector_store %arg6[%c0_12, %c0_13, %c0_14], %18 {strides = array<i32>} : memref<2x2x128xf32, #tpu.memory_space<vmem>>, vector<1x2x128xf32>,
      %c1 = arith.constant 1 : index
      %c0_15 = arith.constant 0 : index
      %c0_16 = arith.constant 0 : index
      %19 = vector.load %arg6[%c1, %c0_15, %c0_16] : memref<2x2x128xf32, #tpu.memory_space<vmem>>, vector<1x2x128xf32>
      %20 = vector.shape_cast %19 : vector<1x2x128xf32> to vector<2x128xf32>
      %21 = arith.maximumf %20, %3 : vector<2x128xf32>
      %c1_17 = arith.constant 1 : index
      %c0_18 = arith.constant 0 : index
      %c0_19 = arith.constant 0 : index
      %22 = vector.load %arg6[%c1_17, %c0_18, %c0_19] : memref<2x2x128xf32, #tpu.memory_space<vmem>>, vector<1x2x128xf32>
      %23 = vector.shape_cast %22 : vector<1x2x128xf32> to vector<2x128xf32>
      %24 = vector.shape_cast %21 : vector<2x128xf32> to vector<1x2x128xf32>
      tpu.vector_store %arg6[%c1_17, %c0_18, %c0_19], %24 {strides = array<i32>} : memref<2x2x128xf32, #tpu.memory_space<vmem>>, vector<1x2x128xf32>,
    } else {
    }
    %c0_i32_7 = arith.constant 0 : i32
    %10 = arith.cmpi eq, %arg1, %c0_i32_7 : i32
    %11 = arith.extui %10 : i1 to i32
    %c0_i32_8 = arith.constant 0 : i32
    %12 = arith.cmpi ne, %11, %c0_i32_8 : i32
    scf.if %12 {
      %c0_9 = arith.constant 0 : index
      %c0_10 = arith.constant 0 : index
      %c0_11 = arith.constant 0 : index
      %13 = vector.load %arg6[%c0_9, %c0_10, %c0_11] : memref<2x2x128xf32, #tpu.memory_space<vmem>>, vector<1x2x128xf32>
      %14 = vector.shape_cast %13 : vector<1x2x128xf32> to vector<2x128xf32>
      %cst_12 = arith.constant 2.500000e-01 : f32
      %15 = vector.broadcast %cst_12 : f32 to vector<2x128xf32>
      %16 = arith.mulf %14, %15 : vector<2x128xf32>
      %c0_13 = arith.constant 0 : index
      %c1 = arith.constant 1 : index
      %c0_14 = arith.constant 0 : index
      %17 = vector.load %arg7[%c0_13, %c1, %c0_14] : memref<2x4x128xf32, #tpu.memory_space<vmem>>, vector<1x2x128xf32>
      %18 = vector.shape_cast %17 : vector<1x2x128xf32> to vector<2x128xf32>
      %19 = vector.shape_cast %16 : vector<2x128xf32> to vector<1x2x128xf32>
      tpu.vector_store %arg7[%c0_13, %c1, %c0_14], %19 {strides = array<i32>} : memref<2x4x128xf32, #tpu.memory_space<vmem>>, vector<1x2x128xf32>,
      %c1_15 = arith.constant 1 : index
      %c0_16 = arith.constant 0 : index
      %c0_17 = arith.constant 0 : index
      %20 = vector.load %arg6[%c1_15, %c0_16, %c0_17] : memref<2x2x128xf32, #tpu.memory_space<vmem>>, vector<1x2x128xf32>
      %21 = vector.shape_cast %20 : vector<1x2x128xf32> to vector<2x128xf32>
      %c1_18 = arith.constant 1 : index
      %c1_19 = arith.constant 1 : index
      %c0_20 = arith.constant 0 : index
      %22 = vector.load %arg7[%c1_18, %c1_19, %c0_20] : memref<2x4x128xf32, #tpu.memory_space<vmem>>, vector<1x2x128xf32>
      %23 = vector.shape_cast %22 : vector<1x2x128xf32> to vector<2x128xf32>
      %24 = vector.shape_cast %21 : vector<2x128xf32> to vector<1x2x128xf32>
      tpu.vector_store %arg7[%c1_18, %c1_19, %c0_20], %24 {strides = array<i32>} : memref<2x4x128xf32, #tpu.memory_space<vmem>>, vector<1x2x128xf32>,
      %c0_21 = arith.constant 0 : index
      %25 = memref.load %arg4[%c0_21] : memref<1xf32, #tpu.memory_space<smem>>
      %26 = vector.broadcast %25 : f32 to vector<2x128xf32>
      %c0_22 = arith.constant 0 : index
      %c0_23 = arith.constant 0 : index
      %c0_24 = arith.constant 0 : index
      %27 = vector.load %arg7[%c0_22, %c0_23, %c0_24] : memref<2x4x128xf32, #tpu.memory_space<vmem>>, vector<1x2x128xf32>
      %28 = vector.shape_cast %27 : vector<1x2x128xf32> to vector<2x128xf32>
      %c0_25 = arith.constant 0 : index
      %c0_26 = arith.constant 0 : index
      %c0_27 = arith.constant 0 : index
      %c0_28 = arith.constant 0 : index
      %29 = vector.load %arg3[%c0_25, %c0_26, %c0_27, %c0_28] : memref<2x3x128x128xf32, #tpu.memory_space<vmem>>, vector<1x1x128x128xf32>
      %30 = vector.shape_cast %29 : vector<1x1x128x128xf32> to vector<128x128xf32>
      %cst_29 = arith.constant dense<0.000000e+00> : vector<2x128xf32>
      %31 = tpu.matmul %28, %30, %cst_29 {dimension_numbers = #tpu.dot_dimension_numbers<[1], [0], [0], [1], [0, 0, 1, 1], [], []>} : vector<2x128xf32>, vector<128x128xf32>, vector<2x128xf32> -> vector<2x128xf32>
      %32 = arith.addf %26, %31 : vector<2x128xf32>
      %c0_30 = arith.constant 0 : index
      %c1_31 = arith.constant 1 : index
      %c0_32 = arith.constant 0 : index
      %33 = vector.load %arg7[%c0_30, %c1_31, %c0_32] : memref<2x4x128xf32, #tpu.memory_space<vmem>>, vector<1x2x128xf32>
      %34 = vector.shape_cast %33 : vector<1x2x128xf32> to vector<2x128xf32>
      %c0_33 = arith.constant 0 : index
      %c1_34 = arith.constant 1 : index
      %c0_35 = arith.constant 0 : index
      %c0_36 = arith.constant 0 : index
      %35 = vector.load %arg3[%c0_33, %c1_34, %c0_35, %c0_36] : memref<2x3x128x128xf32, #tpu.memory_space<vmem>>, vector<1x1x128x128xf32>
      %36 = vector.shape_cast %35 : vector<1x1x128x128xf32> to vector<128x128xf32>
      %cst_37 = arith.constant dense<0.000000e+00> : vector<2x128xf32>
      %37 = tpu.matmul %34, %36, %cst_37 {dimension_numbers = #tpu.dot_dimension_numbers<[1], [0], [0], [1], [0, 0, 1, 1], [], []>} : vector<2x128xf32>, vector<128x128xf32>, vector<2x128xf32> -> vector<2x128xf32>
      %38 = arith.addf %32, %37 : vector<2x128xf32>
      %c0_38 = arith.constant 0 : index
      %c2 = arith.constant 2 : index
      %c0_39 = arith.constant 0 : index
      %39 = vector.load %arg7[%c0_38, %c2, %c0_39] : memref<2x4x128xf32, #tpu.memory_space<vmem>>, vector<1x2x128xf32>
      %40 = vector.shape_cast %39 : vector<1x2x128xf32> to vector<2x128xf32>
      %c0_40 = arith.constant 0 : index
      %c2_41 = arith.constant 2 : index
      %c0_42 = arith.constant 0 : index
      %c0_43 = arith.constant 0 : index
      %41 = vector.load %arg3[%c0_40, %c2_41, %c0_42, %c0_43] : memref<2x3x128x128xf32, #tpu.memory_space<vmem>>, vector<1x1x128x128xf32>
      %42 = vector.shape_cast %41 : vector<1x1x128x128xf32> to vector<128x128xf32>
      %cst_44 = arith.constant dense<0.000000e+00> : vector<2x128xf32>
      %43 = tpu.matmul %40, %42, %cst_44 {dimension_numbers = #tpu.dot_dimension_numbers<[1], [0], [0], [1], [0, 0, 1, 1], [], []>} : vector<2x128xf32>, vector<128x128xf32>, vector<2x128xf32> -> vector<2x128xf32>
      %44 = arith.addf %38, %43 : vector<2x128xf32>
      %c1_45 = arith.constant 1 : index
      %c0_46 = arith.constant 0 : index
      %c0_47 = arith.constant 0 : index
      %45 = vector.load %arg7[%c1_45, %c0_46, %c0_47] : memref<2x4x128xf32, #tpu.memory_space<vmem>>, vector<1x2x128xf32>
      %46 = vector.shape_cast %45 : vector<1x2x128xf32> to vector<2x128xf32>
      %c1_48 = arith.constant 1 : index
      %c0_49 = arith.constant 0 : index
      %c0_50 = arith.constant 0 : index
      %c0_51 = arith.constant 0 : index
      %47 = vector.load %arg3[%c1_48, %c0_49, %c0_50, %c0_51] : memref<2x3x128x128xf32, #tpu.memory_space<vmem>>, vector<1x1x128x128xf32>
      %48 = vector.shape_cast %47 : vector<1x1x128x128xf32> to vector<128x128xf32>
      %cst_52 = arith.constant dense<0.000000e+00> : vector<2x128xf32>
      %49 = tpu.matmul %46, %48, %cst_52 {dimension_numbers = #tpu.dot_dimension_numbers<[1], [0], [0], [1], [0, 0, 1, 1], [], []>} : vector<2x128xf32>, vector<128x128xf32>, vector<2x128xf32> -> vector<2x128xf32>
      %50 = arith.addf %44, %49 : vector<2x128xf32>
      %c1_53 = arith.constant 1 : index
      %c1_54 = arith.constant 1 : index
      %c0_55 = arith.constant 0 : index
      %51 = vector.load %arg7[%c1_53, %c1_54, %c0_55] : memref<2x4x128xf32, #tpu.memory_space<vmem>>, vector<1x2x128xf32>
      %52 = vector.shape_cast %51 : vector<1x2x128xf32> to vector<2x128xf32>
      %c1_56 = arith.constant 1 : index
      %c1_57 = arith.constant 1 : index
      %c0_58 = arith.constant 0 : index
      %c0_59 = arith.constant 0 : index
      %53 = vector.load %arg3[%c1_56, %c1_57, %c0_58, %c0_59] : memref<2x3x128x128xf32, #tpu.memory_space<vmem>>, vector<1x1x128x128xf32>
      %54 = vector.shape_cast %53 : vector<1x1x128x128xf32> to vector<128x128xf32>
      %cst_60 = arith.constant dense<0.000000e+00> : vector<2x128xf32>
      %55 = tpu.matmul %52, %54, %cst_60 {dimension_numbers = #tpu.dot_dimension_numbers<[1], [0], [0], [1], [0, 0, 1, 1], [], []>} : vector<2x128xf32>, vector<128x128xf32>, vector<2x128xf32> -> vector<2x128xf32>
      %56 = arith.addf %50, %55 : vector<2x128xf32>
      %c1_61 = arith.constant 1 : index
      %c2_62 = arith.constant 2 : index
      %c0_63 = arith.constant 0 : index
      %57 = vector.load %arg7[%c1_61, %c2_62, %c0_63] : memref<2x4x128xf32, #tpu.memory_space<vmem>>, vector<1x2x128xf32>
      %58 = vector.shape_cast %57 : vector<1x2x128xf32> to vector<2x128xf32>
      %c1_64 = arith.constant 1 : index
      %c2_65 = arith.constant 2 : index
      %c0_66 = arith.constant 0 : index
      %c0_67 = arith.constant 0 : index
      %59 = vector.load %arg3[%c1_64, %c2_65, %c0_66, %c0_67] : memref<2x3x128x128xf32, #tpu.memory_space<vmem>>, vector<1x1x128x128xf32>
      %60 = vector.shape_cast %59 : vector<1x1x128x128xf32> to vector<128x128xf32>
      %cst_68 = arith.constant dense<0.000000e+00> : vector<2x128xf32>
      %61 = tpu.matmul %58, %60, %cst_68 {dimension_numbers = #tpu.dot_dimension_numbers<[1], [0], [0], [1], [0, 0, 1, 1], [], []>} : vector<2x128xf32>, vector<128x128xf32>, vector<2x128xf32> -> vector<2x128xf32>
      %62 = arith.addf %56, %61 : vector<2x128xf32>
      %63 = arith.negf %62 : vector<2x128xf32>
      %64 = math.exp %63 : vector<2x128xf32>
      %cst_69 = arith.constant 1.000000e+00 : f32
      %65 = vector.broadcast %cst_69 : f32 to vector<2x128xf32>
      %66 = arith.addf %65, %64 : vector<2x128xf32>
      %67 = arith.divf %65, %66 : vector<2x128xf32>
      %c0_70 = arith.constant 0 : index
      %c0_71 = arith.constant 0 : index
      %c0_72 = arith.constant 0 : index
      %68 = vector.load %arg5[%c0_70, %c0_71, %c0_72] : memref<1x2x128xf32, #tpu.memory_space<vmem>>, vector<1x2x128xf32>
      %69 = vector.shape_cast %68 : vector<1x2x128xf32> to vector<2x128xf32>
      %70 = vector.shape_cast %67 : vector<2x128xf32> to vector<1x2x128xf32>
      tpu.vector_store %arg5[%c0_70, %c0_71, %c0_72], %70 {strides = array<i32>} : memref<1x2x128xf32, #tpu.memory_space<vmem>>, vector<1x2x128xf32>,
    } else {
    }
    return
  }
  func.func @transform_0(%arg0: i32, %arg1: i32) -> (i32, i32, i32, i32) {
    %c0_i32 = arith.constant 0 : i32
    %c0_i32_0 = arith.constant 0 : i32
    %c0_i32_1 = arith.constant 0 : i32
    return %arg0, %arg1, %c0_i32, %c0_i32_0 : i32, i32, i32, i32
  }
  func.func @transform_1(%arg0: i32, %arg1: i32) -> (i32, i32, i32, i32) {
    %c0_i32 = arith.constant 0 : i32
    %c0_i32_0 = arith.constant 0 : i32
    %c0_i32_1 = arith.constant 0 : i32
    %c0_i32_2 = arith.constant 0 : i32
    %c0_i32_3 = arith.constant 0 : i32
    return %c0_i32, %c0_i32_0, %c0_i32_1, %c0_i32_2 : i32, i32, i32, i32
  }
  func.func @transform_2(%arg0: i32, %arg1: i32) -> i32 {
    %c0_i32 = arith.constant 0 : i32
    %c0_i32_0 = arith.constant 0 : i32
    return %c0_i32 : i32
  }
  func.func @transform_3(%arg0: i32, %arg1: i32) -> (i32, i32, i32) {
    %c0_i32 = arith.constant 0 : i32
    %c0_i32_0 = arith.constant 0 : i32
    %c0_i32_1 = arith.constant 0 : i32
    return %arg0, %c0_i32, %c0_i32_0 : i32, i32, i32
  }
}

</mosaic_0001>

<bundles_post_ra>
// kernel: tpu_custom_call.1
= control target key start
LH: loop header
LB: loop body
LE: loop exit
PB: predicated region body
PF: predicated region fallthrough
CT: control target
= control target key end

     0   :  { %s1964_s0 = inlined_call_operand.hbm [shape: f32[2,4,2,128], index: 0, kind: input, shape index: {}]   ;;  %s1965_s1 = inlined_call_operand.hbm [shape: f32[2,3,128,128], index: 1, kind: input, shape index: {}]   ;;  %s1966_s2 = inlined_call_operand.<no memory space> [shape: f32[1], index: 2, kind: input, shape index: {}]   ;;  %s1967_s3 = inlined_call_operand.hbm [shape: f32[2,2,128], index: 3, kind: output, shape index: {}]  }
   0x1   :  { %8 = sst [smem:[#allocation4]] %s1966_s2 }
   0x2   :  { %9 = vsyncpa [#allocation6], 0 }
   0x3   :  { %11 = vsyncpa [#allocation6 + $0x1], 0 }
   0x4   :  { %12 = vsyncpa [#allocation9], 0 }
   0x5   :  { %13 = vsyncpa [#allocation7], 0 }
   0x6   :  { %15 = vsyncpa [#allocation7 + $0x1], 0  ;;  %s1668_s14 = smov 0   ;;  %s1670_s15 = smov 0  }
   0x7   :  { %s1672_s16 = smov 0   ;;  %s1674_s17 = smov 0  }
   0x8   :  { %s1676_s18 = smov 0   ;;  %s1678_s19 = smov 0  }
   0x9 LB: > { %s921_s2 = sadd.s32 4294967295, %s1633_s19   ;;  %s922_s20 = sadd.s32 4294967294, %s1633_s19   ;;  %s1633_s19 = sphi %s1678_s19, %s21_s19   ;;  %s1629_s18 = sphi %s1676_s18, %s1991_s18   ;;  %s1625_s17 = sphi %s1674_s17, %s1990_s17   ;;  %s1621_s16 = sphi %s1672_s16, %s1989_s16   ;;  %s1617_s15 = sphi %s1670_s15, %s1988_s15   ;;  %s1613_s14 = sphi %s1668_s14, %s1987_s14  }
   0xa   : > { %p55_p0 = scmp.ne.s32.totalorder %s1617_s15, %s1613_s14  ;;  %p1702_p1 = scmp.eq.s32.totalorder %s921_s2, 0 }
   0xb   : > { %p1706_p2 = scmp.eq.s32.totalorder %s921_s2, 1  ;;  %p127_p3 = scmp.eq.s32.totalorder %s922_s20, 1 }
   0xc   : > { %s1972_s21 = scalar_select %p1702_p1, 1, 0 }
   0xd   : > { %s1973_s22 = scalar_select %p1706_p2, 1, 0 }
   0xe   : > { %p1712_p4 = por %p1702_p1, %p55_p0  ;;  %p923_p5 = scmp.ge.s32.totalorder %s1633_s19, 1 }
   0xf   : > { %p1717_p6 = por %p127_p3, %p55_p0  ;;  %p134_p7 = scmp.lt.s32.totalorder %s1633_s19, 3 }
  0x10   : > { %s1974_s23 = scalar_select %p1712_p4, 1, 0 }
  0x11   : > { %s1975_s24 = scalar_select %p1717_p6, 1, 0 }
  0x12   : > { %p1722_p8 = pnand %p923_p5, %p134_p7  ;;  %s1635_s26 = smov [#allocation8]  }
  0x13   : > { %s146_s27 = sshll.u32 %s1635_s26, 4  ;;  %s33_s29 = sadd.s32 1, %s1629_s18  ;;  %s147_s27 = int_to_ptr.vmem [resolvable:$true] %s146_s27 }
  0x14   : > { %s1976_s25 = scalar_select %p1722_p8, 1, 0 }
  0x15   : > { %p1413_p9 = pneg %p1722_p8  ;;  %s1489_s5 = scalar_lea.hbm %s1965_s1, 12288 }
  0x16   : > { %p1490_p12 = scmp.ne.s32.totalorder %s1965_s1, %s1489_s5  ;;  %p1496_p5 = scmp.lt.u32.totalorder %s1489_s5, %s1965_s1 }
  0x17   : > { %p1731_p11 = pnand %p1413_p9, %p1702_p1 }
  0x19   : > { %p1491_p13 = pneg %p1731_p11 }
  0x1b   : > { %p1492_p0 = pnand %p1491_p13, %p1490_p12 }
  0x1d   : > { %p1493_p3 = pneg %p1492_p0 }
  0x1f   : > { %p1498_p7 = pnand %p1496_p5, %p1493_p3 }
  0x21   : > { %1501 = shalt.err (!%p1498_p7)
}
  0x22   : > { %s1502_s10 = scalar_lea.vmem %s147_s27, 12288  ;;  %p1510_p1 = scmp.lt.s32.totalorder %s147_s27, %s147_s27 }
  0x23   : > { %p1503_p9 = scmp.ne.s32.totalorder %s147_s27, %s1502_s10  ;;  %p1511_p4 = scmp.lt.s32.totalorder %s1502_s10, %s1502_s10 }
  0x25   : > { %p1505_p10 = pnand %p1503_p9, %p1491_p13  ;;  %p1512_p8 = por %p1511_p4, %p1510_p1 }
  0x27   : > { %p1506_p6 = pneg %p1505_p10 }
  0x29   : > { %p1513_p2 = pnand %p1512_p8, %p1506_p6 }
  0x2b   : > { %1516 = shalt.err (!%p1513_p2)
}
  0x2c   : > { %s1636_s11 = smov 128   ;;  %s1637_s12 = smov 8  }
  0x2d   : > { %1416 = dma.hbm_to_vmem [thread:$0]  (!%p1731_p11), %s1965_s1, 12288, %s147_s27, [#allocation9], %s1636_s11, %s1636_s11, %s1637_s12  }
  0x2e   : > { %p35_p1 = scmp.ge.s32.totalorder %s33_s29, 2  ;;  %s42_s20 = sadd.s32 1, %s1621_s16 }
  0x2f   : > { %p49_p2 = scmp.ne.s32.totalorder %s1621_s16, %s1617_s15  ;;  %p50_p4 = scmp.eq.s32.totalorder %s1633_s19, 0 }
  0x30   : > { %s1993_s29 = smov (%p35_p1, %s33_s29), 0  ;;  %p1979_p8 = scmp.ne.s32.totalorder %s1973_s22, 0 }
  0x31   : > { %p1758_p6 = por %p50_p4, %p49_p2  ;;  %s37_s28 = ssub.s32 %s1629_s18, %s1993_s29 }
  0x32   : > { %p1764_p10 = por %p1979_p8, %p49_p2  ;;  %p1426_p12 = scmp.lt.s32.totalorder %s1633_s19, 2 }
  0x33   : > { %p40_p11 = scmp.eq.s32.totalorder %s37_s28, 0  ;;  %s163_s27 = sand.u32 1, %s1621_s16  }
  0x34   : > { %s926_s4 = sshll.u32 %s163_s27, 3  ;;  %s938_s6 = sshll.u32 %s1629_s18, 7 }
  0x35   : > { %s1773_s5 = scalar_select %p40_p11, %s1621_s16, %s42_s20  }
  0x36   : > { %s1779_s9 = scalar_lea.hbm %s1964_s0, %s938_s6  ;;  %s167_s22 = scalar_lea.vmem [#allocation5], %s926_s4 }
  0x37   : > { %s176_s10 = sshll.u32 %s167_s22, 4  ;;  %p1785_p13 = pnand %p1426_p12, %p1758_p6  ;;  %s1781_s10 = int_to_ptr.vmem [resolvable:$true] %s176_s10 }
  0x38   : > { %s1789_s12 = scalar_lea.sflag [#allocation6], %s163_s27  ;;  %s1517_s13 = scalar_lea.hbm %s1779_s9, 128 }
  0x39   : > { %p1518_p0 = scmp.ne.s32.totalorder %s1779_s9, %s1517_s13  ;;  %p1519_p3 = pneg %p1785_p13 }
  0x3a   : > { %s1522_s26 = scalar_lea.hbm %s1964_s0, 256  ;;  %p1523_p9 = scmp.lt.u32.totalorder %s1779_s9, %s1964_s0 }
  0x3b   : > { %p1520_p5 = pnand %p1519_p3, %p1518_p0  ;;  %p1524_p1 = scmp.lt.u32.totalorder %s1522_s26, %s1517_s13 }
  0x3c   : > { %p1526_p4 = scmp.lt.u32.totalorder %s1517_s13, %s1779_s9 }
  0x3d   : > { %p1521_p7 = pneg %p1520_p5  ;;  %p1525_p2 = por %p1524_p1, %p1523_p9 }
  0x3f   : > { %p1527_p6 = por %p1526_p4, %p1525_p2 }
  0x41   : > { %p1528_p8 = pnand %p1527_p6, %p1521_p7 }
  0x43   : > { %1531 = shalt.err (!%p1528_p8)
}
  0x44   : > { %s1532_s27 = scalar_lea.vmem %s1781_s10, 128  ;;  %s1638_s6 = smov [#allocation5]  }
  0x45   : > { %p1533_p12 = scmp.ne.s32.totalorder %s1781_s10, %s1532_s27  ;;  %s1537_s7 = sshll.u32 %s1638_s6, 4  ;;  %s1538_s7 = int_to_ptr.vmem [resolvable:$false] %s1537_s7 }
  0x46   : > { %s1539_s8 = scalar_lea.vmem %s1538_s7, 256  ;;  %p1540_p5 = scmp.lt.s32.totalorder %s1781_s10, %s1538_s7 }
  0x47   : > { %p1535_p11 = pnand %p1533_p12, %p1519_p3  ;;  %p1541_p9 = scmp.lt.s32.totalorder %s1539_s8, %s1532_s27 }
  0x49   : > { %p1536_p0 = pneg %p1535_p11  ;;  %p1542_p1 = por %p1541_p9, %p1540_p5 }
  0x4b   : > { %p1543_p2 = pnand %p1542_p1, %p1536_p0 }
  0x4d   : > { %1546 = shalt.err (!%p1543_p2)
}
  0x4e   : > { %s1639_s22 = smov 32   ;;  %s1640_s13 = smov 2  }
  0x4f   : > { %1420 = dma.hbm_to_vmem [thread:$0]  (!%p1785_p13), %s1779_s9, 128, %s1781_s10, %s1789_s12, %s1639_s22, %s1639_s22, %s1640_s13  }
  0x50   : > { %p1982_p3 = scmp.ne.s32.totalorder %s1976_s25, 0 }
  0x51   : > { %s1820_s2 = sand.u32 (!%p1982_p3), 1, %s1617_s15   ;;  %p1983_p7 = scmp.ne.s32.totalorder (!%p1982_p3), %s1974_s23, 0 }
  0x52   : > { %188 = sbr.rel (%p1982_p3) target bundleno = 448 (0x1c0), region = 32  ;;  %s930_s20 = sshll.u32 (!%p1982_p3), %s1820_s2, 3 }
  0x53   : > { %s191_s26 = scalar_lea.sflag (!%p1982_p3), [#allocation6], %s1820_s2  ;;  %s1824_s28 = scalar_lea.vmem (!%p1982_p3), [#allocation5], %s930_s20 }
  0x59   : > { %1600 = dma.done.wait (%p1983_p7), %s191_s26, 128  }
  0x5a   : > { %1602 = vsyncadd (%p1983_p7), %s191_s26, 4294967168  ;;  %p1984_p13 = scmp.ne.s32.totalorder %s1972_s21, 0 }
  0x5c   : > { %1604 = dma.done.wait (%p1984_p13), [#allocation9], 12288  }
  0x5d   : > { %1606 = vsyncadd (%p1984_p13), [#allocation9], 4294955008  ;;  %v1641_v0 = vmov 0.0|0.0   ;;  %v1642_v1 = vmov 0.0   ;;  %vm1643_vm0 = vmmov 0   ;;  %v277_v2 = vld [vmem:[#allocation8] sm:$0xff] }
  0x5e   : > { %1251 = vmatprep.subr.bf16.mxu1 %v1641_v0  ;;  %1323 = vmatprep.subr.bf16.mxu0 %v1641_v0  ;;  %248 = vst [vmem:[#allocation3] sm:$0x1] %v1642_v1  ;;  %250 = vst [vmem:[#allocation3 + $0x4] sm:$0x1] %v1642_v1  ;;  %v278_v3 = vld [vmem:[#allocation8 + $0x8] sm:$0xff]  ;;  %v544_v4 = vld [vmem:[#allocation8 + $0x180] sm:$0xff] }
  0x5f   : > { %251 = vst [vmem:[#allocation3 + $0x3] sm:$0x1] %v1642_v1  ;;  %252 = vst [vmem:[#allocation3 + $0x7] sm:$0x1] %v1642_v1  ;;  %1073 = vmatprep.mubr.msk.f32.mxu1 %vm1643_vm0, %v1642_v1  ;;  %1178 = vmatprep.mubr.msk.f32.mxu0 %vm1643_vm0, %v1642_v1  ;;  %v1252_v5 = vpack.c.bf16 %v278_v3, %v277_v2  ;;  %v545_v6 = vld [vmem:[#allocation8 + $0x188] sm:$0xff]  ;;  %v279_v7 = vld [vmem:[#allocation8 + $0x10] sm:$0xff] }
  0x60   : > { %v280_v8 = vld [vmem:[#allocation8 + $0x18] sm:$0xff]  ;;  %v1324_v9 = vpack.c.bf16 %v545_v6, %v544_v4  ;;  %v546_v10 = vld [vmem:[#allocation8 + $0x190] sm:$0xff]  ;;  %v281_v14 = vld [vmem:[#allocation8 + $0x20] sm:$0xff]  ;;  %vm226_vm1 = vcmask 1041408   ;;  %s274_s21 = sld [smem:[#allocation4]]  ;;  %s932_s23 = sshll.u32 %s1820_s2, 1 }
  0x61   : > { %v547_v11 = vld [vmem:[#allocation8 + $0x198] sm:$0xff]  ;;  %1253 = vmatpush3.bf16.msra.mxu1 %v1252_v5  ;;  %v1255_v12 = vpack.c.bf16 %v280_v8, %v279_v7  ;;  %v282_v15 = vld [vmem:[#allocation8 + $0x28] sm:$0xff]  ;;  %v548_v16 = vld [vmem:[#allocation8 + $0x1a0] sm:$0xff]  ;;  %s935_s25 = sshll.u32 %s1625_s17, 5  ;;  %s220_s9 = scalar_lea.vmem [#allocation10], %s932_s23 }
  0x62   : > { %1325 = vmatpush3.bf16.msra.mxu0 %v1324_v9  ;;  %1254 = vmatprep.subr.bf16.mxu1 %v1641_v0  ;;  %v1327_v13 = vpack.c.bf16 %v547_v11, %v546_v10  ;;  %v549_v17 = vld [vmem:[#allocation8 + $0x1a8] sm:$0xff]  ;;  %v1258_v18 = vpack.c.bf16 %v282_v15, %v281_v14  ;;  %v283_v20 = vld [vmem:[#allocation8 + $0x30] sm:$0xff]  ;;  %v284_v21 = vld [vmem:[#allocation8 + $0x38] sm:$0xff]  ;;  %s830_s10 = sshll.u32 %s220_s9, 4  ;;  %s1915_s4 = scalar_lea.hbm %s1967_s3, %s935_s25  ;;  %s1917_s10 = int_to_ptr.vmem [resolvable:$true] %s830_s10 }
  0x63   : > { %1326 = vmatprep.subr.bf16.mxu0 %v1641_v0  ;;  %v1330_v19 = vpack.c.bf16 %v549_v17, %v548_v16  ;;  %v550_v22 = vld [vmem:[#allocation8 + $0x1b0] sm:$0xff]  ;;  %v551_v23 = vld [vmem:[#allocation8 + $0x1b8] sm:$0xff]  ;;  %v1261_v25 = vpack.c.bf16 %v284_v21, %v283_v20  ;;  %v285_v30 = vld [vmem:[#allocation8 + $0x40] sm:$0xff]  ;;  %s817_s27 = scalar_lea.sflag [#allocation7], %s1820_s2  ;;  %s1547_s6 = scalar_lea.vmem %s1917_s10, 32 }
  0x64   : > { %v222_v24 = vld [vmem:[%s1824_s28] sm:$0x3]  ;;  %v223_v26 = vld [vmem:[%s1824_s28 + $0x2] sm:$0x3]  ;;  %v224_v27 = vld [vmem:[%s1824_s28 + $0x4] sm:$0x3]  ;;  %v1333_v29 = vpack.c.bf16 %v551_v23, %v550_v22  ;;  %p1548_p4 = scmp.ne.s32.totalorder %s1917_s10, %s1547_s6 }
  0x65   : > { %1256 = vmatpush3.bf16.msra.mxu1 %v1255_v12  ;;  %v225_v28 = vld [vmem:[%s1824_s28 + $0x6] sm:$0x3]  ;;  %v286_v31 = vld [vmem:[#allocation8 + $0x48] sm:$0xff]  ;;  %v227_v32 = vsel %vm226_vm1, %v222_v24, 0.0  ;;  %v228_v33 = vsel %vm226_vm1, %v223_v26, 0.0  ;;  %v230_v34 = vsel %vm226_vm1, %v224_v27, 0.0 }
  0x66   : > { %1328 = vmatpush3.bf16.msra.mxu0 %v1327_v13  ;;  %1257 = vmatprep.subr.bf16.mxu1 %v1641_v0  ;;  %v552_v35 = vld [vmem:[#allocation8 + $0x1c0] sm:$0xff]  ;;  %v553_v36 = vld [vmem:[#allocation8 + $0x1c8] sm:$0xff]  ;;  %v229_v37 = vadd.f32 %v228_v33, %v227_v32  ;;  %v234_v38 = vsel %vm226_vm1, %v222_v24, -inf  ;;  %v235_v39 = vsel %vm226_vm1, %v223_v26, -inf  ;;  %v232_v40 = vsel %vm226_vm1, %v225_v28, 0.0  ;;  %v287_v48 = vld [vmem:[#allocation8 + $0x50] sm:$0xff]  ;;  %p1549_p6 = pnand %p1548_p4, %p1764_p10 }
  0x67   : > { %1329 = vmatprep.subr.bf16.mxu0 %v1641_v0  ;;  %v236_v41 = vsel %vm226_vm1, %v224_v27, -inf  ;;  %v237_v42 = vsel %vm226_vm1, %v225_v28, -inf  ;;  %v238_v43 = vmax.f32 %v234_v38, %v235_v39  ;;  %v1264_v44 = vpack.c.bf16 %v286_v31, %v285_v30  ;;  %v288_v49 = vld [vmem:[#allocation8 + $0x58] sm:$0xff]  ;;  %v554_v50 = vld [vmem:[#allocation8 + $0x1d0] sm:$0xff]  ;;  %v289_v56 = vld [vmem:[#allocation8 + $0x60] sm:$0xff]  ;;  %s1644_s17 = smov [#allocation10]  }
  0x68   : > { %v231_v45 = vadd.f32 %v230_v34, %v229_v37  ;;  %v239_v46 = vmax.f32 %v236_v41, %v237_v42  ;;  %v1336_v47 = vpack.c.bf16 %v553_v36, %v552_v35  ;;  %v555_v51 = vld [vmem:[#allocation8 + $0x1d8] sm:$0xff]  ;;  %v1267_v54 = vpack.c.bf16 %v288_v49, %v287_v48  ;;  %v290_v57 = vld [vmem:[#allocation8 + $0x68] sm:$0xff]  ;;  %v556_v58 = vld [vmem:[#allocation8 + $0x1e0] sm:$0xff]  ;;  %p1550_p8 = pneg %p1549_p6  ;;  %s1551_s7 = sshll.u32 %s1644_s17, 4  ;;  %s1552_s7 = int_to_ptr.vmem [resolvable:$false] %s1551_s7 }
  0x69   : > { %1259 = vmatpush3.bf16.msra.mxu1 %v1258_v18  ;;  %v1339_v55 = vpack.c.bf16 %v555_v51, %v554_v50  ;;  %v557_v59 = vld [vmem:[#allocation8 + $0x1e8] sm:$0xff]  ;;  %v1270_v60 = vpack.c.bf16 %v290_v57, %v289_v56  ;;  %v291_v62 = vld [vmem:[#allocation8 + $0x70] sm:$0xff]  ;;  %v292_v63 = vld [vmem:[#allocation8 + $0x78] sm:$0xff]  ;;  %s1553_s8 = scalar_lea.vmem %s1552_s7, 64  ;;  %p1554_p12 = scmp.lt.s32.totalorder %s1917_s10, %s1552_s7 }
  0x6a   : > { %1331 = vmatpush3.bf16.msra.mxu0 %v1330_v19  ;;  %1260 = vmatprep.subr.bf16.mxu1 %v1641_v0  ;;  %v233_v52 = vadd.f32 %v232_v40, %v231_v45  ;;  %v240_v53 = vmax.f32 %v238_v43, %v239_v46  ;;  %v1342_v61 = vpack.c.bf16 %v557_v59, %v556_v58  ;;  %v558_v2 = vld [vmem:[#allocation8 + $0x1f0] sm:$0xff]  ;;  %v559_v3 = vld [vmem:[#allocation8 + $0x1f8] sm:$0xff]  ;;  %v633_v9 = vld [vmem:[#allocation8 + $0x200] sm:$0xff]  ;;  %p1555_p11 = scmp.lt.s32.totalorder %s1553_s8, %s1547_s6 }
  0x6b   : > { %1332 = vmatprep.subr.bf16.mxu0 %v1641_v0  ;;  %v1273_v6 = vpack.c.bf16 %v292_v63, %v291_v62  ;;  %v1345_v8 = vpack.c.bf16 %v559_v3, %v558_v2  ;;  %v634_v10 = vld [vmem:[#allocation8 + $0x208] sm:$0xff]  ;;  %v366_v11 = vld [vmem:[#allocation8 + $0x80] sm:$0xff]  ;;  %v635_v14 = vld [vmem:[#allocation8 + $0x210] sm:$0xff] }
  0x6c   : > { %245 = vst [vmem:[#allocation2] sm:$0x3] %v233_v52  ;;  %247 = vst [vmem:[#allocation2 + $0x2] sm:$0x3] %v240_v53  ;;  %v367_v12 = vld [vmem:[#allocation8 + $0x88] sm:$0xff]  ;;  %v1348_v13 = vpack.c.bf16 %v634_v10, %v633_v9  ;;  %v636_v15 = vld [vmem:[#allocation8 + $0x218] sm:$0xff]  ;;  %p1556_p0 = por %p1555_p11, %p1554_p12 }
  0x6d   : > { %1262 = vmatpush3.bf16.msra.mxu1 %v1261_v25  ;;  %v1276_v16 = vpack.c.bf16 %v367_v12, %v366_v11  ;;  %v368_v18 = vld [vmem:[#allocation8 + $0x90] sm:$0xff]  ;;  %v369_v19 = vld [vmem:[#allocation8 + $0x98] sm:$0xff]  ;;  %v1351_v21 = vpack.c.bf16 %v636_v15, %v635_v14  ;;  %v637_v22 = vld [vmem:[#allocation8 + $0x220] sm:$0xff] }
  0x6e   : > { %1334 = vmatpush3.bf16.msra.mxu0 %v1333_v29  ;;  %1263 = vmatprep.subr.bf16.mxu1 %v1641_v0  ;;  %v638_v23 = vld [vmem:[#allocation8 + $0x228] sm:$0xff]  ;;  %v1279_v24 = vpack.c.bf16 %v369_v19, %v368_v18  ;;  %v370_v25 = vld [vmem:[#allocation8 + $0xa0] sm:$0xff]  ;;  %v639_v28 = vld [vmem:[#allocation8 + $0x230] sm:$0xff]  ;;  %p1557_p5 = pnand %p1556_p0, %p1550_p8 }
  0x6f   : > { %1335 = vmatprep.subr.bf16.mxu0 %v1641_v0  ;;  %v371_v26 = vld [vmem:[#allocation8 + $0xa8] sm:$0xff]  ;;  %v1354_v27 = vpack.c.bf16 %v638_v23, %v637_v22  ;;  %v640_v29 = vld [vmem:[#allocation8 + $0x238] sm:$0xff]  ;;  %v372_v31 = vld [vmem:[#allocation8 + $0xb0] sm:$0xff] }
  0x70   : > { %v1282_v30 = vpack.c.bf16 %v371_v26, %v370_v25  ;;  %v373_v32 = vld [vmem:[#allocation8 + $0xb8] sm:$0xff]  ;;  %v1357_v33 = vpack.c.bf16 %v640_v29, %v639_v28  ;;  %v641_v34 = vld [vmem:[#allocation8 + $0x240] sm:$0xff]  ;;  %v642_v35 = vld [vmem:[#allocation8 + $0x248] sm:$0xff] }
  0x71   : > { %1265 = vmatpush3.bf16.msra.mxu1 %v1264_v44  ;;  %v1285_v36 = vpack.c.bf16 %v373_v32, %v372_v31  ;;  %v374_v37 = vld [vmem:[#allocation8 + $0xc0] sm:$0xff]  ;;  %v375_v38 = vld [vmem:[#allocation8 + $0xc8] sm:$0xff]  ;;  %v1360_v39 = vpack.c.bf16 %v642_v35, %v641_v34  ;;  %v643_v40 = vld [vmem:[#allocation8 + $0x250] sm:$0xff] }
  0x72   : > { %1337 = vmatpush3.bf16.msra.mxu0 %v1336_v47  ;;  %1266 = vmatprep.subr.bf16.mxu1 %v1641_v0  ;;  %v644_v41 = vld [vmem:[#allocation8 + $0x258] sm:$0xff]  ;;  %v1288_v42 = vpack.c.bf16 %v375_v38, %v374_v37  ;;  %v376_v43 = vld [vmem:[#allocation8 + $0xd0] sm:$0xff]  ;;  %v645_v46 = vld [vmem:[#allocation8 + $0x260] sm:$0xff] }
  0x73   : > { %1338 = vmatprep.subr.bf16.mxu0 %v1641_v0  ;;  %v267_v4 = vld [vmem:[#allocation2] sm:$0x3]  ;;  %v271_v5 = vld [vmem:[#allocation2 + $0x2] sm:$0x3]  ;;  %v377_v44 = vld [vmem:[#allocation8 + $0xd8] sm:$0xff]  ;;  %v1363_v45 = vpack.c.bf16 %v644_v41, %v643_v40 }
  0x74   : > { %v268_v7 = vmul.f32 0.25, %v267_v4  ;;  %273 = vst [vmem:[#allocation3 + $0x5] sm:$0x3] %v271_v5  ;;  %v646_v47 = vld [vmem:[#allocation8 + $0x268] sm:$0xff]  ;;  %v1291_v48 = vpack.c.bf16 %v377_v44, %v376_v43  ;;  %v378_v49 = vld [vmem:[#allocation8 + $0xe0] sm:$0xff]  ;;  %v647_v52 = vld [vmem:[#allocation8 + $0x270] sm:$0xff] }
  0x75   : > { %1268 = vmatpush3.bf16.msra.mxu1 %v1267_v54  ;;  %v379_v50 = vld [vmem:[#allocation8 + $0xe8] sm:$0xff]  ;;  %v1366_v51 = vpack.c.bf16 %v646_v47, %v645_v46  ;;  %v648_v53 = vld [vmem:[#allocation8 + $0x278] sm:$0xff]  ;;  %v722_v58 = vld [vmem:[#allocation8 + $0x280] sm:$0xff] }
  0x76   : > { %1340 = vmatpush3.bf16.msra.mxu0 %v1339_v55  ;;  %1269 = vmatprep.subr.bf16.mxu1 %v1641_v0  ;;  %269 = vst [vmem:[#allocation3 + $0x1] sm:$0x3] %v268_v7  ;;  %v1294_v54 = vpack.c.bf16 %v379_v50, %v378_v49  ;;  %v380_v55 = vld [vmem:[#allocation8 + $0xf0] sm:$0xff]  ;;  %v381_v56 = vld [vmem:[#allocation8 + $0xf8] sm:$0xff]  ;;  %v1369_v57 = vpack.c.bf16 %v648_v53, %v647_v52  ;;  %v723_v59 = vld [vmem:[#allocation8 + $0x288] sm:$0xff] }
  0x77   : > { %1341 = vmatprep.subr.bf16.mxu0 %v1641_v0  ;;  %v456_v62 = vld [vmem:[#allocation8 + $0x108] sm:$0xff]  ;;  %v1372_v2 = vpack.c.bf16 %v723_v59, %v722_v58  ;;  %v724_v3 = vld [vmem:[#allocation8 + $0x290] sm:$0xff]  ;;  %v725_v4 = vld [vmem:[#allocation8 + $0x298] sm:$0xff] }
  0x78   : > { %v457_v7 = vld [vmem:[#allocation8 + $0x110] sm:$0xff]  ;;  %v1375_v9 = vpack.c.bf16 %v725_v4, %v724_v3  ;;  %v726_v10 = vld [vmem:[#allocation8 + $0x2a0] sm:$0xff]  ;;  %v727_v11 = vld [vmem:[#allocation8 + $0x2a8] sm:$0xff] }
  0x79   : > { %1271 = vmatpush3.bf16.msra.mxu1 %v1270_v60  ;;  %v1297_v60 = vpack.c.bf16 %v381_v56, %v380_v55  ;;  %v460_v14 = vld [vmem:[#allocation8 + $0x128] sm:$0xff]  ;;  %v1378_v15 = vpack.c.bf16 %v727_v11, %v726_v10  ;;  %v461_v19 = vld [vmem:[#allocation8 + $0x130] sm:$0xff]  ;;  %v733_v28 = vld [vmem:[#allocation8 + $0x2d8] sm:$0xff] }
  0x7a   : > { %1343 = vmatpush3.bf16.msra.mxu0 %v1342_v61  ;;  %1272 = vmatprep.subr.bf16.mxu1 %v1641_v0  ;;  %v455_v61 = vld [vmem:[#allocation8 + $0x100] sm:$0xff]  ;;  %v731_v22 = vld [vmem:[#allocation8 + $0x2c8] sm:$0xff]  ;;  %v466_v31 = vld [vmem:[#allocation8 + $0x158] sm:$0xff] }
  0x7b   : > { %1344 = vmatprep.subr.bf16.mxu0 %v1641_v0  ;;  %v542_v17 = vld [vmem:[#allocation3 + $0x4] sm:$0x3]  ;;  %v737_v40 = vld [vmem:[#allocation8 + $0x2f8] sm:$0xff]  ;;  %v720_v46 = vld [vmem:[#allocation3 + $0x6] sm:$0x3] }
  0x7c   : > { %v631_v63 = vld [vmem:[#allocation3 + $0x5] sm:$0x3]  ;;  %v470_v43 = vld [vmem:[#allocation8 + $0x178] sm:$0xff] }
  0x7d   : > { %1274 = vmatpush3.bf16.msra.mxu1 %v1273_v6  ;;  %v276_v20 = vld [vmem:[#allocation3] sm:$0x3]  ;;  %v1300_v6 = vpack.c.bf16 %v456_v62, %v455_v61  ;;  %v453_v47 = vld [vmem:[#allocation3 + $0x2] sm:$0x3] }
  0x7e   : > { %1346 = vmatpush3.bf16.msra.mxu0 %v1345_v8  ;;  %1275 = vmatprep.subr.bf16.mxu1 %v1641_v0  ;;  %v364_v5 = vld [vmem:[#allocation3 + $0x1] sm:$0x3]  ;;  %v458_v8 = vld [vmem:[#allocation8 + $0x118] sm:$0xff] }
  0x7f   : > { %1347 = vmatprep.subr.bf16.mxu0 %v1641_v0  ;;  %v1303_v12 = vpack.c.bf16 %v458_v8, %v457_v7  ;;  %v464_v25 = vld [vmem:[#allocation8 + $0x148] sm:$0xff] }
  0x80   : > { %1074 = vmatmul.mubr.f32.vlgmr.msra.gmra.mrb[0].mxu1 %v276_v20  ;;  %v462_v20 = vld [vmem:[#allocation8 + $0x138] sm:$0xff]  ;;  %v735_v34 = vld [vmem:[#allocation8 + $0x2e8] sm:$0xff] }
  0x81   : > { %1179 = vmatmul.mubr.f32.vlgmr.msra.gmra.mrb[0].mxu0 %v542_v17  ;;  %1277 = vmatpush3.bf16.msra.mxu1 %v1276_v16  ;;  %v728_v16 = vld [vmem:[#allocation8 + $0x2b0] sm:$0xff]  ;;  %v729_v17 = vld [vmem:[#allocation8 + $0x2b8] sm:$0xff]  ;;  %v1309_v23 = vpack.c.bf16 %v462_v20, %v461_v19  ;;  %v468_v37 = vld [vmem:[#allocation8 + $0x168] sm:$0xff] }
  0x82   : > { %1349 = vmatpush3.bf16.msra.mxu0 %v1348_v13  ;;  %1213 = vmatprep.mubr.msk.f32.mxu0 %vm1643_vm0, %v1642_v1  ;;  %v459_v13 = vld [vmem:[#allocation8 + $0x120] sm:$0xff] }
  0x83   : > { %1350 = vmatprep.subr.bf16.mxu0 %v1641_v0  ;;  %1108 = vmatprep.mubr.msk.f32.mxu1 %vm1643_vm0, %v1642_v1  ;;  %v1306_v18 = vpack.c.bf16 %v460_v14, %v459_v13 }
  0x84   : > { %1278 = vmatprep.subr.bf16.mxu1 %v1641_v0 }
  0x85   : > { %1280 = vmatpush3.bf16.msra.mxu1 %v1279_v24  ;;  %v463_v24 = vld [vmem:[#allocation8 + $0x140] sm:$0xff] }
  0x86   : > { %1352 = vmatpush3.bf16.msra.mxu0 %v1351_v21  ;;  %1281 = vmatprep.subr.bf16.mxu1 %v1641_v0  ;;  %v1381_v21 = vpack.c.bf16 %v729_v17, %v728_v16  ;;  %v1312_v29 = vpack.c.bf16 %v464_v25, %v463_v24 }
  0x87   : > { %1353 = vmatprep.subr.bf16.mxu0 %v1641_v0 }
  0x89   : > { %1283 = vmatpush3.bf16.msra.mxu1 %v1282_v30  ;;  %v465_v30 = vld [vmem:[#allocation8 + $0x150] sm:$0xff] }
  0x8a   : > { %1355 = vmatpush3.bf16.msra.mxu0 %v1354_v27  ;;  %1284 = vmatprep.subr.bf16.mxu1 %v1641_v0  ;;  %v732_v27 = vld [vmem:[#allocation8 + $0x2d0] sm:$0xff]  ;;  %v1315_v35 = vpack.c.bf16 %v466_v31, %v465_v30 }
  0x8b   : > { %1356 = vmatprep.subr.bf16.mxu0 %v1641_v0  ;;  %v1387_v32 = vpack.c.bf16 %v733_v28, %v732_v27 }
  0x8d   : > { %1286 = vmatpush3.bf16.msra.mxu1 %v1285_v36  ;;  %v467_v36 = vld [vmem:[#allocation8 + $0x160] sm:$0xff] }
  0x8e   : > { %1358 = vmatpush3.bf16.msra.mxu0 %v1357_v33  ;;  %1287 = vmatprep.subr.bf16.mxu1 %v1641_v0  ;;  %v734_v33 = vld [vmem:[#allocation8 + $0x2e0] sm:$0xff]  ;;  %v1318_v41 = vpack.c.bf16 %v468_v37, %v467_v36 }
  0x8f   : > { %1359 = vmatprep.subr.bf16.mxu0 %v1641_v0  ;;  %v1390_v38 = vpack.c.bf16 %v735_v34, %v734_v33 }
  0x91   : > { %1289 = vmatpush3.bf16.msra.mxu1 %v1288_v42  ;;  %v469_v42 = vld [vmem:[#allocation8 + $0x170] sm:$0xff] }
  0x92   : > { %1361 = vmatpush3.bf16.msra.mxu0 %v1360_v39  ;;  %1290 = vmatprep.subr.bf16.mxu1 %v1641_v0  ;;  %v736_v39 = vld [vmem:[#allocation8 + $0x2f0] sm:$0xff] }
  0x93   : > { %1362 = vmatprep.subr.bf16.mxu0 %v1641_v0  ;;  %v1393_v44 = vpack.c.bf16 %v737_v40, %v736_v39 }
  0x95   : > { %1292 = vmatpush3.bf16.msra.mxu1 %v1291_v48  ;;  %v275_v48 = vstv %s274_s21 }
  0x96   : > { %1364 = vmatpush3.bf16.msra.mxu0 %v1363_v45  ;;  %1293 = vmatprep.subr.bf16.mxu1 %v1641_v0  ;;  %v1321_v45 = vpack.c.bf16 %v470_v43, %v469_v42 }
  0x97   : > { %1365 = vmatprep.subr.bf16.mxu0 %v1641_v0 }
  0x99   : > { %1295 = vmatpush3.bf16.msra.mxu1 %v1294_v54 }
  0x9a   : > { %1367 = vmatpush3.bf16.msra.mxu0 %v1366_v51  ;;  %1296 = vmatprep.subr.bf16.mxu1 %v1641_v0 }
  0x9b   : > { %1368 = vmatprep.subr.bf16.mxu0 %v1641_v0 }
  0x9d   : > { %1298 = vmatpush3.bf16.msra.mxu1 %v1297_v60 }
  0x9e   : > { %1370 = vmatpush3.bf16.msra.mxu0 %v1369_v57  ;;  %1299 = vmatprep.subr.bf16.mxu1 %v1641_v0 }
  0x9f   : > { %1371 = vmatprep.subr.bf16.mxu0 %v1641_v0 }
  0xa0   : > { %1109 = vmatmul.mubr.f32.vlgmr.msra.gmra.mrb[0].mxu1 %v364_v5 }
  0xa1   : > { %1214 = vmatmul.mubr.f32.vlgmr.msra.gmra.mrb[0].mxu0 %v631_v63  ;;  %1301 = vmatpush3.bf16.msra.mxu1 %v1300_v6 }
  0xa2   : > { %1373 = vmatpush3.bf16.msra.mxu0 %v1372_v2  ;;  %1248 = vmatprep.mubr.msk.f32.mxu0 %vm1643_vm0, %v1642_v1 }
  0xa3   : > { %1374 = vmatprep.subr.bf16.mxu0 %v1641_v0  ;;  %1143 = vmatprep.mubr.msk.f32.mxu1 %vm1643_vm0, %v1642_v1  ;;  %v730_v1 = vld [vmem:[#allocation8 + $0x2c0] sm:$0xff] }
  0xa4   : > { %1302 = vmatprep.subr.bf16.mxu1 %v1641_v0  ;;  %v1384_v26 = vpack.c.bf16 %v731_v22, %v730_v1 }
  0xa5   : > { %1304 = vmatpush3.bf16.msra.mxu1 %v1303_v12 }
  0xa6   : > { %1376 = vmatpush3.bf16.msra.mxu0 %v1375_v9  ;;  %1305 = vmatprep.subr.bf16.mxu1 %v1641_v0 }
  0xa7   : > { %1377 = vmatprep.subr.bf16.mxu0 %v1641_v0 }
  0xa9   : > { %1307 = vmatpush3.bf16.msra.mxu1 %v1306_v18 }
  0xaa   : > { %1379 = vmatpush3.bf16.msra.mxu0 %v1378_v15  ;;  %1308 = vmatprep.subr.bf16.mxu1 %v1641_v0 }
  0xab   : > { %1380 = vmatprep.subr.bf16.mxu0 %v1641_v0 }
  0xad   : > { %1310 = vmatpush3.bf16.msra.mxu1 %v1309_v23 }
  0xae   : > { %1382 = vmatpush3.bf16.msra.mxu0 %v1381_v21  ;;  %1311 = vmatprep.subr.bf16.mxu1 %v1641_v0 }
  0xaf   : > { %1383 = vmatprep.subr.bf16.mxu0 %v1641_v0 }
  0xb1   : > { %1313 = vmatpush3.bf16.msra.mxu1 %v1312_v29 }
  0xb2   : > { %1385 = vmatpush3.bf16.msra.mxu0 %v1384_v26  ;;  %1314 = vmatprep.subr.bf16.mxu1 %v1641_v0 }
  0xb3   : > { %1386 = vmatprep.subr.bf16.mxu0 %v1641_v0 }
  0xb5   : > { %1316 = vmatpush3.bf16.msra.mxu1 %v1315_v35 }
  0xb6   : > { %1388 = vmatpush3.bf16.msra.mxu0 %v1387_v32  ;;  %1317 = vmatprep.subr.bf16.mxu1 %v1641_v0 }
  0xb7   : > { %1389 = vmatprep.subr.bf16.mxu0 %v1641_v0 }
  0xb9   : > { %1319 = vmatpush3.bf16.msra.mxu1 %v1318_v41 }
  0xba   : > { %1391 = vmatpush3.bf16.msra.mxu0 %v1390_v38  ;;  %1320 = vmatprep.subr.bf16.mxu1 %v1641_v0 }
  0xbb   : > { %1392 = vmatprep.subr.bf16.mxu0 %v1641_v0 }
  0xbd   : > { %1322 = vmatpush3.bf16.msra.mxu1 %v1321_v45 }
  0xbe   : > { %1394 = vmatpush3.bf16.msra.mxu0 %v1393_v44 }
  0xc0   : > { %1144 = vmatmul.mubr.f32.vlgmr.msra.gmra.mrb[0].mxu1 %v453_v47 }
  0xc1   : > { %1249 = vmatmul.mubr.f32.vlgmr.msra.gmra.mrb[0].mxu0 %v720_v46 }
 0x193   : > { %v537_v51 = vpop.f32.mrb[0].mxu1 }
 0x194   : > { %v804_v49 = vpop.f32.mrb[0].mxu0  ;;  %v1395_v52 = vadd.f32 %v537_v51, %v275_v48  ;;  %v1145_v53 = vpop.f32.mrb[1].mxu1 }
 0x195   : > { %v1250_v50 = vpop.f32.mrb[1].mxu0 }
 0x196   : > { %v1396_v54 = vadd.f32 %v1395_v52, %v804_v49 }
 0x198   : > { %v933_v55 = vmul.f32 -1.442695, %v1396_v54 }
 0x19a   : > { %1485 = vpow2.f32 %v933_v55 }
 0x1a4   : > { %v1486_v0 = vpop.eup %1485 }
 0x1a5   : > { %v812_v56 = vadd.f32 1.0, %v1486_v0 }
 0x1a7   : > { %1487 = vrcp.f32 %v812_v56 }
 0x1b1   : > { %v1488_v57 = vpop.eup %1487 }
 0x1b2   : > { %815 = vst [vmem:[%s220_s9] sm:$0x3] %v1488_v57 }
 0x1b3   : > { %1560 = shalt.err (!%p1557_p5)
}
 0x1b4   : > { %s1561_s22 = scalar_lea.hbm %s1915_s4, 32  ;;  %s1565_s20 = scalar_lea.hbm %s1967_s3, 64 }
 0x1b5   : > { %p1562_p9 = scmp.ne.s32.totalorder %s1915_s4, %s1561_s22  ;;  %p1566_p3 = scmp.lt.u32.totalorder %s1915_s4, %s1967_s3 }
 0x1b6   : > { %p1567_p7 = scmp.lt.u32.totalorder %s1565_s20, %s1561_s22  ;;  %p1569_p4 = scmp.lt.u32.totalorder %s1561_s22, %s1915_s4 }
 0x1b7   : > { %p1563_p1 = pnand %p1562_p9, %p1764_p10 }
 0x1b8   : > { %p1568_p13 = por %p1567_p7, %p1566_p3 }
 0x1b9   : > { %p1564_p2 = pneg %p1563_p1 }
 0x1ba   : > { %p1570_p6 = por %p1569_p4, %p1568_p13 }
 0x1bc   : > { %p1571_p8 = pnand %p1570_p6, %p1564_p2 }
 0x1be   : > { %1574 = shalt.err (!%p1571_p8)
}
 0x1bf   : > { %1411 = dma.vmem_to_hbm [thread:$0]  (%p1764_p10), %s1917_s10, 32, %s1915_s4, %s817_s27  }
 0x1c0 PF: > { %s842_s21 = sand.u32 1, %s1613_s14   ;;  %p1985_p12 = scmp.ne.s32.totalorder %s1975_s24, 0 }
 0x1c1   : > { %p1986_p11 = scmp.ge.s32.totalorder %s1633_s19, 2  ;;  %s843_s23 = scalar_lea.sflag [#allocation7], %s842_s21 }
 0x1c3   : > { %p1422_p0 = pnand %p1986_p11, %p1985_p12 }
 0x1c5   : > { %1608 = dma.done.wait (!%p1422_p0), %s843_s23, 32  }
 0x1c6   : > { %1610 = vsyncadd (!%p1422_p0), %s843_s23, 4294967264  ;;  %s21_s19 = sadd.s32 1, %s1633_s19   ;;  %s1987_s14 = smov %s1617_s15 }
 0x1c7   : > { %p18_p5 = scmp.ge.s32.totalorder %s21_s19, 4   ;;  %s1988_s15 = smov %s1621_s16 }
 0x1c8   : > { %s1989_s16 = smov %s1773_s5  ;;  %s1990_s17 = smov %s1629_s18 }
 0x1c9   : > { %s1991_s18 = smov %s1993_s29  ;;  %20 = sbr.rel (!%p18_p5) target bundleno = 9 (0x9), region = 103 }
 0x1d0   :  { %848 = vsyncpa [#allocation6], 1 }
 0x1d1   :  { %850 = vsyncpa [#allocation6 + $0x1], 1 }
 0x1d2   :  { %851 = vsyncpa [#allocation9], 1 }
 0x1d3   :  { %852 = vsyncpa [#allocation7], 1 }
 0x1d4   :  { %854 = vsyncpa [#allocation7 + $0x1], 1 }

</bundles_post_ra>
